<compile_context>
chip_gen: v6e
topology: v6e:2x2x1
jax: 0.10.0
libtpu: 0.0.40
codegen_flags: <defaults>
</compile_context>

<pallas_src>
import jax
import jax.numpy as jnp
from jax import lax
from jax.experimental import pallas as pl
from jax.experimental.pallas import tpu as pltpu

_EPS = 1e-5  # nn.LayerNorm default


# ------------------------------------------------------------------ VMEM budget

def _vmem_limit_bytes():
    """Per-generation compiler VMEM cap (headroom below physical capacity)."""
    try:
        cap = int(pltpu.get_tpu_info().vmem_capacity_bytes)
    except Exception:                     # query unavailable -> assume v7x-sized VMEM
        cap = 64 << 20
    # ~96 MiB usable on the 128 MiB chips (v5e/v6e), ~48 MiB on v7x (64 MiB).
    return max(min((cap * 3) // 4, 96 << 20), 32 << 20)


def _supports_pipeline_mode():
    try:
        pl.BlockSpec((8, 128), lambda i: (0, 0), pipeline_mode=pl.Buffered(1))
        return True
    except (AttributeError, TypeError):
        return False


_SINGLE_BUFFER_OK = _supports_pipeline_mode()


def _const_spec(block_shape, index_map):
    """BlockSpec for a grid-invariant operand: single pipeline buffer (the
    default second buffer is pure VMEM waste when the block never changes)."""
    if _SINGLE_BUFFER_OK:
        return pl.BlockSpec(block_shape, index_map, pipeline_mode=pl.Buffered(1))
    return pl.BlockSpec(block_shape, index_map)


def _pick_block_rows(n_rows, d, itemsize, requested, *, budget, extra_bytes=0,
                     f32_temps=3, align=8, min_steps=8, min_rows=256):
    """Largest aligned row tile that fits `budget`, while leaving >= min_steps
    grid steps (DMA/compute overlap on both v7x cores) when tiles can stay
    >= min_rows rows (per-step overhead ~0.35us)."""
    n_rows = int(n_rows)
    if n_rows <= align:
        return max(n_rows, 1)
    # double-buffered input + output row tiles + in-kernel f32 temporaries
    per_row = 4 * d * itemsize + f32_temps * d * 4
    avail = max(int(budget) - int(extra_bytes), per_row * align)
    bn = min(int(requested), avail // per_row, n_rows)
    if n_rows >= min_rows * min_steps:
        bn = min(bn, max(min_rows, -(-n_rows // min_steps)))   # ceil div
    bn = max(align, (min(bn, n_rows) // align) * align)
    return int(bn)


# ------------------------------------------------------------------ kernels

def _layernorm_kernel(x_ref, g_ref, b_ref, o_ref):
    """LayerNorm over the last dim of a (block_rows, D) tile, f32 math."""
    x = x_ref[...].astype(jnp.float32)
    mean = jnp.mean(x, axis=-1, keepdims=True)
    xc = x - mean
    var = jnp.mean(xc * xc, axis=-1, keepdims=True)          # biased, like PyTorch
    inv = lax.rsqrt(var + _EPS)
    y = xc * inv * g_ref[...].astype(jnp.float32) + b_ref[...].astype(jnp.float32)
    o_ref[...] = y.astype(o_ref.dtype)


def _ln_matmul_tanh(x_ref, g_ref, b_ref, w_ref, bias_ref):
    """Shared body: returns (x_f32, tanh(LayerNorm(x) @ W_cols + bias_cols))."""
    x = x_ref[...].astype(jnp.float32)
    mean = jnp.mean(x, axis=-1, keepdims=True)
    xc = x - mean
    var = jnp.mean(xc * xc, axis=-1, keepdims=True)
    inv = lax.rsqrt(var + _EPS)
    normed = xc * inv * g_ref[...].astype(jnp.float32) + b_ref[...].astype(jnp.float32)
    # MXU matmul: operands in W's dtype (bf16 for MXU-sized D), f32 accumulate.
    h = jnp.dot(normed.astype(w_ref.dtype), w_ref[...],
                preferred_element_type=jnp.float32)
    return x, jnp.tanh(h + bias_ref[...].astype(jnp.float32))


def _fused_kernel(x_ref, g_ref, b_ref, w_ref, bias_ref, o_ref):
    """W fully resident: out = x + tanh(LN(x) @ W + bias)   (dropout = identity)."""
    x, h = _ln_matmul_tanh(x_ref, g_ref, b_ref, w_ref, bias_ref)
    o_ref[...] = (x + h).astype(o_ref.dtype)


def _fused_kernel_coltiled(x_ref, xres_ref, g_ref, b_ref, w_ref, bias_ref, o_ref):
    """W output-column tiled: residual columns arrive via xres_ref (avoids a
    dynamic lane slice of the full-width x tile)."""
    _, h = _ln_matmul_tanh(x_ref, g_ref, b_ref, w_ref, bias_ref)
    o_ref[...] = (xres_ref[...].astype(jnp.float32) + h).astype(o_ref.dtype)


# ------------------------------------------------------------------ wrappers

def sublayer_connection_fused(x, W, bias, gamma, beta, *,
                              block_rows=1024, col_tile=None):
    """Fully fused: x + tanh(LayerNorm(x) @ W + bias), one pallas_call."""
    orig_shape = x.shape
    d = orig_shape[-1]
    assert W.shape == (d, d), "sublayer must preserve the feature size"
    x2 = x.reshape(-1, d)
    n_rows = x2.shape[0]
    itemsize = jnp.dtype(x.dtype).itemsize

    limit = _vmem_limit_bytes()
    budget = (limit * 2) // 3                       # headroom below the compiler cap

    # bf16 operands for the MXU (f32 accumulate) once D is MXU-sized; halves W's
    # HBM DMA and VMEM footprint.  Tiny D is VPU work -> keep the input dtype.
    use_mxu = d >= 256
    w_dtype = jnp.bfloat16 if (use_mxu and W.dtype == jnp.float32) else W.dtype
    Wc = W.astype(w_dtype)
    w_itemsize = jnp.dtype(w_dtype).itemsize

    # Output-column tile for W: keep the full matrix resident when small,
    # otherwise bound its VMEM cost (critical on v7x's 64 MiB VMEM).
    if col_tile is None:
        col_tile = d
        if d * d * w_itemsize > budget // 4 and d % 256 == 0:
            for tn_cand in (2048, 1024, 512, 256):
                if d % tn_cand == 0 and 2 * d * tn_cand * w_itemsize <= budget // 4:
                    col_tile = tn_cand
                    break
    tn = int(col_tile)
    assert d % tn == 0, "col_tile must divide the feature dim"
    n_cols = d // tn
    col_tiled = n_cols > 1

    # VMEM accounting: W buffers + in-kernel f32 temporaries (x, normed, h, xres).
    w_bufs = 2 if col_tiled else (1 if _SINGLE_BUFFER_OK else 2)
    w_bytes = w_bufs * d * tn * w_itemsize
    f32_temps = 4 if col_tiled else 3
    align = 256 if (use_mxu and n_rows >= 256) else 8     # MXU-friendly tiles
    bn = _pick_block_rows(n_rows, d, itemsize, block_rows, budget=budget,
                          extra_bytes=w_bytes, f32_temps=f32_temps, align=align)

    grid = (pl.cdiv(n_rows, bn), n_cols)                  # no jnp.pad round trip

    x_spec = pl.BlockSpec((bn, d), lambda i, j: (i, 0))   # resident across col steps
    vec_spec = _const_spec((1, d), lambda i, j: (0, 0))
    out_spec = pl.BlockSpec((bn, tn), lambda i, j: (i, j))

    if col_tiled:
        w_spec = pl.BlockSpec((d, tn), lambda i, j: (0, j))
        bias_spec = pl.BlockSpec((1, tn), lambda i, j: (0, j))
        xres_spec = pl.BlockSpec((bn, tn), lambda i, j: (i, j))
        kernel = _fused_kernel_coltiled
        in_specs = [x_spec, xres_spec, vec_spec, vec_spec, w_spec, bias_spec]
        args = (x2, x2, gamma.reshape(1, d), beta.reshape(1, d), Wc,
                bias.reshape(1, d))
    else:
        w_spec = _const_spec((d, d), lambda i, j: (0, 0))
        bias_spec = _const_spec((1, d), lambda i, j: (0, 0))
        kernel = _fused_kernel
        in_specs = [x_spec, vec_spec, vec_spec, w_spec, bias_spec]
        args = (x2, gamma.reshape(1, d), beta.reshape(1, d), Wc,
                bias.reshape(1, d))

    out = pl.pallas_call(
        kernel,
        out_shape=jax.ShapeDtypeStruct((n_rows, d), x.dtype),
        grid=grid,
        in_specs=in_specs,
        out_specs=out_spec,
        compiler_params=pltpu.CompilerParams(
            dimension_semantics=("parallel", "parallel"),
            vmem_limit_bytes=limit,
        ),
    )(*args)

    return out.reshape(orig_shape)


def sublayer_connection(x, sublayer, gamma, beta, *, block_rows=1024):
    """General path: Pallas LayerNorm, arbitrary sublayer callable, JAX residual.

    The residual add stays in plain JAX so XLA can fuse it into the sublayer's
    epilogue.  NOTE: if the sublayer starts with a matmul, a plain-jnp LayerNorm
    can also be fused by XLA -- prefer the standalone Pallas LN only when
    profiling shows XLA fails to fuse it.
    """
    orig_shape = x.shape
    d = orig_shape[-1]
    x2 = x.reshape(-1, d)
    n_rows = x2.shape[0]
    itemsize = jnp.dtype(x.dtype).itemsize

    limit = _vmem_limit_bytes()
    bn = _pick_block_rows(n_rows, d, itemsize, block_rows,
                          budget=(limit * 2) // 3, f32_temps=2)
    grid = (pl.cdiv(n_rows, bn),)                         # no jnp.pad round trip

    row_spec = pl.BlockSpec((bn, d), lambda i: (i, 0))
    vec_spec = _const_spec((1, d), lambda i: (0, 0))

    normed = pl.pallas_call(
        _layernorm_kernel,
        out_shape=jax.ShapeDtypeStruct((n_rows, d), x.dtype),
        grid=grid,
        in_specs=[row_spec, vec_spec, vec_spec],
        out_specs=row_spec,
        compiler_params=pltpu.CompilerParams(
            dimension_semantics=("parallel",),
            vmem_limit_bytes=limit,
        ),
    )(x2, gamma.reshape(1, d), beta.reshape(1, d))

    normed = normed.reshape(orig_shape)
    # dropout = identity (eval mode); residual add fuses into the sublayer epilogue.
    return x + sublayer(normed)


# ------------------------------------------------------------------ reference

def _reference(x, sublayer, gamma, beta):
    mean = jnp.mean(x, axis=-1, keepdims=True)
    var = jnp.mean((x - mean) ** 2, axis=-1, keepdims=True)
    normed = (x - mean) / jnp.sqrt(var + _EPS) * gamma + beta
    return x + sublayer(normed)


if __name__ == "__main__":
    key = jax.random.PRNGKey(0)
    k_x1, k_x2, k_w1, k_b1, k_w2, k_b2 = jax.random.split(key, 6)

    # ---- small config (toy sizes; 14 rows exercises the masked partial tile) ----
    B, S, SIZE = 2, 7, 32
    x_s = jax.random.normal(k_x1, (B, S, SIZE), dtype=jnp.float32)
    gamma_s = jnp.ones((SIZE,), jnp.float32)          # nn.LayerNorm defaults
    beta_s = jnp.zeros((SIZE,), jnp.float32)
    W_s = jax.random.normal(k_w1, (SIZE, SIZE), jnp.float32) * 0.05
    b_s = jax.random.normal(k_b1, (SIZE,), jnp.float32) * 0.05
    sub_s = lambda y: jnp.tanh(y @ W_s + b_s)

    out_fused_s = jax.block_until_ready(
        sublayer_connection_fused(x_s, W_s, b_s, gamma_s, beta_s))
    out_gen_s = jax.block_until_ready(
        sublayer_connection(x_s, sub_s, gamma_s, beta_s))
    ref_s = _reference(x_s, sub_s, gamma_s, beta_s)
    assert out_fused_s.shape == x_s.shape and out_fused_s.dtype == x_s.dtype
    assert out_gen_s.shape == x_s.shape and out_gen_s.dtype == x_s.dtype
    assert jnp.allclose(out_fused_s, ref_s, atol=1e-4, rtol=1e-4), "small fused mismatch"
    assert jnp.allclose(out_gen_s, ref_s, atol=1e-4, rtol=1e-4), "small general mismatch"

    # ---- MXU-sized config: bf16 matmul, 256-aligned row tiles, W column tiling ----
    Bl, Sl, D = 1, 384, 1024                          # 384 rows -> partial 256-row tile
    x_l = jax.random.normal(k_x2, (Bl, Sl, D), dtype=jnp.float32)
    gamma_l = jnp.ones((D,), jnp.float32)
    beta_l = jnp.zeros((D,), jnp.float32)
    W_l = jax.random.normal(k_w2, (D, D), jnp.float32) * 0.02
    b_l = jax.random.normal(k_b2, (D,), jnp.float32) * 0.02
    sub_l = lambda y: jnp.tanh(y @ W_l + b_l)

    out_fused_l = jax.block_until_ready(
        sublayer_connection_fused(x_l, W_l, b_l, gamma_l, beta_l, col_tile=512))
    out_gen_l = jax.block_until_ready(
        sublayer_connection(x_l, sub_l, gamma_l, beta_l))
    ref_l = _reference(x_l, sub_l, gamma_l, beta_l)
    assert out_fused_l.shape == x_l.shape and out_fused_l.dtype == x_l.dtype
    # bf16 MXU operands (f32 accumulation) -> looser tolerance vs the f32 reference.
    assert jnp.allclose(out_fused_l, ref_l, atol=3e-2, rtol=3e-2), "large fused mismatch"
    assert jnp.allclose(out_gen_l, ref_l, atol=1e-4, rtol=1e-4), "large general mismatch"

    print("KERNEL_OK")
</pallas_src>

<mosaic_0001>
module attributes {stable_mosaic.version = 11 : i64} {
  func.func @_fused_kernel(%arg0: i32, %arg1: i32, %arg2: memref<8x32xf32, #tpu.memory_space<vmem>>, %arg3: memref<1x32xf32, #tpu.memory_space<vmem>>, %arg4: memref<1x32xf32, #tpu.memory_space<vmem>>, %arg5: memref<32x32xf32, #tpu.memory_space<vmem>>, %arg6: memref<1x32xf32, #tpu.memory_space<vmem>>, %arg7: memref<8x32xf32, #tpu.memory_space<vmem>>) attributes {dimension_semantics = [#tpu.dimension_semantics<parallel>, #tpu.dimension_semantics<parallel>], iteration_bounds = array<i64: 2, 1>, scalar_prefetch = 0 : i64, scratch_operands = 0 : i64, tpu.core_type = #tpu.core_type<tc>, window_params = [{transform_indices = @transform_0, window_bounds = array<i64: 8, 32>}, {pipeline_mode = #tpu.pipeline_mode<synchronous>, transform_indices = @transform_1, window_bounds = array<i64: 1, 32>}, {pipeline_mode = #tpu.pipeline_mode<synchronous>, transform_indices = @transform_2, window_bounds = array<i64: 1, 32>}, {pipeline_mode = #tpu.pipeline_mode<synchronous>, transform_indices = @transform_3, window_bounds = array<i64: 32, 32>}, {pipeline_mode = #tpu.pipeline_mode<synchronous>, transform_indices = @transform_4, window_bounds = array<i64: 1, 32>}, {transform_indices = @transform_5, window_bounds = array<i64: 8, 32>}]} {
    %c0 = arith.constant 0 : index
    %c0_0 = arith.constant 0 : index
    %0 = vector.load %arg2[%c0, %c0_0] : memref<8x32xf32, #tpu.memory_space<vmem>>, vector<8x32xf32>
    %cst = arith.constant dense<0.000000e+00> : vector<8xf32>
    %1 = vector.multi_reduction <add>, %0, %cst [1] : vector<8x32xf32> to vector<8xf32>
    %2 = vector.shape_cast %1 : vector<8xf32> to vector<8x1xf32>
    %cst_1 = arith.constant 3.200000e+01 : f32
    %3 = vector.broadcast %cst_1 : f32 to vector<8x1xf32>
    %4 = arith.divf %2, %3 : vector<8x1xf32>
    %5 = vector.broadcast %4 : vector<8x1xf32> to vector<8x32xf32>
    %6 = arith.subf %0, %5 : vector<8x32xf32>
    %7 = arith.mulf %6, %6 : vector<8x32xf32>
    %cst_2 = arith.constant dense<0.000000e+00> : vector<8xf32>
    %8 = vector.multi_reduction <add>, %7, %cst_2 [1] : vector<8x32xf32> to vector<8xf32>
    %9 = vector.shape_cast %8 : vector<8xf32> to vector<8x1xf32>
    %cst_3 = arith.constant 3.200000e+01 : f32
    %10 = vector.broadcast %cst_3 : f32 to vector<8x1xf32>
    %11 = arith.divf %9, %10 : vector<8x1xf32>
    %cst_4 = arith.constant 9.99999974E-6 : f32
    %12 = vector.broadcast %cst_4 : f32 to vector<8x1xf32>
    %13 = arith.addf %11, %12 : vector<8x1xf32>
    %14 = math.rsqrt %13 : vector<8x1xf32>
    %15 = vector.broadcast %14 : vector<8x1xf32> to vector<8x32xf32>
    %16 = arith.mulf %6, %15 : vector<8x32xf32>
    %c0_5 = arith.constant 0 : index
    %c0_6 = arith.constant 0 : index
    %17 = vector.load %arg3[%c0_5, %c0_6] : memref<1x32xf32, #tpu.memory_space<vmem>>, vector<1x32xf32>
    %18 = vector.broadcast %17 : vector<1x32xf32> to vector<8x32xf32>
    %19 = arith.mulf %16, %18 : vector<8x32xf32>
    %c0_7 = arith.constant 0 : index
    %c0_8 = arith.constant 0 : index
    %20 = vector.load %arg4[%c0_7, %c0_8] : memref<1x32xf32, #tpu.memory_space<vmem>>, vector<1x32xf32>
    %21 = vector.broadcast %20 : vector<1x32xf32> to vector<8x32xf32>
    %22 = arith.addf %19, %21 : vector<8x32xf32>
    %c0_9 = arith.constant 0 : index
    %c0_10 = arith.constant 0 : index
    %23 = vector.load %arg5[%c0_9, %c0_10] : memref<32x32xf32, #tpu.memory_space<vmem>>, vector<32x32xf32>
    %cst_11 = arith.constant dense<0.000000e+00> : vector<8x32xf32>
    %24 = tpu.matmul %22, %23, %cst_11 {dimension_numbers = #tpu.dot_dimension_numbers<[1], [0], [0], [1], [0, 0, 1, 1], [], []>} : vector<8x32xf32>, vector<32x32xf32>, vector<8x32xf32> -> vector<8x32xf32>
    %c0_12 = arith.constant 0 : index
    %c0_13 = arith.constant 0 : index
    %25 = vector.load %arg6[%c0_12, %c0_13] : memref<1x32xf32, #tpu.memory_space<vmem>>, vector<1x32xf32>
    %26 = vector.broadcast %25 : vector<1x32xf32> to vector<8x32xf32>
    %27 = arith.addf %24, %26 : vector<8x32xf32>
    %28 = math.tanh %27 : vector<8x32xf32>
    %29 = arith.addf %0, %28 : vector<8x32xf32>
    %c0_14 = arith.constant 0 : index
    %c0_15 = arith.constant 0 : index
    %30 = vector.load %arg7[%c0_14, %c0_15] : memref<8x32xf32, #tpu.memory_space<vmem>>, vector<8x32xf32>
    tpu.vector_store %arg7[%c0_14, %c0_15], %29 {strides = array<i32>} : memref<8x32xf32, #tpu.memory_space<vmem>>, vector<8x32xf32>,
    return
  }
  func.func @transform_0(%arg0: i32, %arg1: i32) -> (i32, i32) {
    %c0_i32 = arith.constant 0 : i32
    %c0_i32_0 = arith.constant 0 : i32
    return %arg0, %c0_i32 : i32, i32
  }
  func.func @transform_1(%arg0: i32, %arg1: i32) -> (i32, i32) {
    %c0_i32 = arith.constant 0 : i32
    %c0_i32_0 = arith.constant 0 : i32
    %c0_i32_1 = arith.constant 0 : i32
    return %c0_i32, %c0_i32_0 : i32, i32
  }
  func.func @transform_2(%arg0: i32, %arg1: i32) -> (i32, i32) {
    %c0_i32 = arith.constant 0 : i32
    %c0_i32_0 = arith.constant 0 : i32
    %c0_i32_1 = arith.constant 0 : i32
    return %c0_i32, %c0_i32_0 : i32, i32
  }
  func.func @transform_3(%arg0: i32, %arg1: i32) -> (i32, i32) {
    %c0_i32 = arith.constant 0 : i32
    %c0_i32_0 = arith.constant 0 : i32
    %c0_i32_1 = arith.constant 0 : i32
    return %c0_i32, %c0_i32_0 : i32, i32
  }
  func.func @transform_4(%arg0: i32, %arg1: i32) -> (i32, i32) {
    %c0_i32 = arith.constant 0 : i32
    %c0_i32_0 = arith.constant 0 : i32
    %c0_i32_1 = arith.constant 0 : i32
    return %c0_i32, %c0_i32_0 : i32, i32
  }
  func.func @transform_5(%arg0: i32, %arg1: i32) -> (i32, i32) {
    %c0_i32 = arith.constant 0 : i32
    return %arg0, %arg1 : i32, i32
  }
}

</mosaic_0001>

<bundles_post_ra>
// kernel: tpu_custom_call.1
= control target key start
LH: loop header
LB: loop body
LE: loop exit
PB: predicated region body
PF: predicated region fallthrough
CT: control target
= control target key end

     0   :  { %s969_s0 = inlined_call_operand.hbm [shape: f32[14,32], index: 0, kind: input, shape index: {}]   ;;  %s970_s1 = inlined_call_operand.vmem [shape: f32[1,32], index: 1, kind: input, shape index: {}]   ;;  %s971_s2 = inlined_call_operand.vmem [shape: f32[1,32], index: 2, kind: input, shape index: {}]   ;;  %s972_s3 = inlined_call_operand.hbm [shape: f32[32,32], index: 3, kind: input, shape index: {}]   ;;  %s973_s4 = inlined_call_operand.vmem [shape: f32[1,32], index: 4, kind: input, shape index: {}]   ;;  %s974_s5 = inlined_call_operand.hbm [shape: f32[14,32], index: 5, kind: output, shape index: {}]  }
   0x1   :  { %977 = sst [smem:[#allocation12_spill]] %s972_s3 }
   0x2   :  { %10 = vsyncpa [#allocation3], 0 }
   0x3   :  { %12 = vsyncpa [#allocation3 + $0x1], 0 }
   0x4   :  { %13 = vsyncpa [#allocation6], 0 }
   0x5   :  { %14 = vsyncpa [#allocation4], 0 }
   0x6   :  { %16 = vsyncpa [#allocation4 + $0x1], 0  ;;  %s785_s18 = smov 0   ;;  %s787_s19 = smov 0  }
   0x7   :  { %s789_s20 = smov 0   ;;  %s791_s21 = smov 0  }
   0x8   :  { %s793_s22 = smov 0   ;;  %s795_s23 = smov 0  }
   0x9 LB: > { %s492_s24 = sadd.s32 4294967295, %s746_s23   ;;  %s493_s25 = sadd.s32 4294967294, %s746_s23   ;;  %s746_s23 = sphi %s795_s23, %s22_s23   ;;  %s742_s22 = sphi %s793_s22, %s997_s22   ;;  %s738_s21 = sphi %s791_s21, %s996_s21   ;;  %s734_s20 = sphi %s789_s20, %s995_s20   ;;  %s730_s19 = sphi %s787_s19, %s994_s19   ;;  %s726_s18 = sphi %s785_s18, %s993_s18  }
   0xa   : > { %p54_p0 = scmp.ne.s32.totalorder %s730_s19, %s726_s18  ;;  %p819_p1 = scmp.eq.s32.totalorder %s492_s24, 0 }
   0xb   : > { %p823_p2 = scmp.eq.s32.totalorder %s492_s24, 1  ;;  %p170_p3 = scmp.eq.s32.totalorder %s493_s25, 1 }
   0xc   : > { %p829_p4 = por %p819_p1, %p54_p0  ;;  %p494_p5 = scmp.ge.s32.totalorder %s746_s23, 1 }
   0xd   : > { %p834_p6 = por %p170_p3, %p54_p0  ;;  %p177_p7 = scmp.lt.s32.totalorder %s746_s23, 3 }
   0xe   : > { %s980_s28 = scalar_select %p829_p4, 1, 0 }
   0xf   : > { %s981_s29 = scalar_select %p834_p6, 1, 0 }
  0x10   : > { %p839_p8 = pnand %p494_p5, %p177_p7  ;;  %s748_s6 = smov [#allocation5]  }
  0x11   : > { %s195_s7 = sshll.u32 %s748_s6, 4  ;;  %s34_s9 = sadd.s32 1, %s742_s22  ;;  %s196_s7 = int_to_ptr.vmem [resolvable:$true] %s195_s7 }
  0x12   : > { %p535_p9 = pneg %p839_p8  ;;  %s619_s10 = scalar_lea.vmem %s196_s7, 512 }
  0x13   : > { %p620_p13 = scmp.ne.s32.totalorder %s196_s7, %s619_s10  ;;  %p627_p5 = scmp.lt.s32.totalorder %s196_s7, %s196_s7 }
  0x14   : > { %p848_p11 = pnand %p535_p9, %p819_p1  ;;  %p628_p7 = scmp.lt.s32.totalorder %s619_s10, %s619_s10 }
  0x16   : > { %p610_p12 = pneg %p848_p11  ;;  %p629_p6 = por %p628_p7, %p627_p5 }
  0x18   : > { %p622_p0 = pnand %p620_p13, %p610_p12 }
  0x1a   : > { %p623_p3 = pneg %p622_p0 }
  0x1c   : > { %p630_p4 = pnand %p629_p6, %p623_p3 }
  0x1e   : > { %633 = shalt.err (!%p630_p4)
}
  0x1f   : > { %s749_s11 = smov 128   ;;  %s750_s12 = smov 8  }
  0x20   : > { %s984_s3 = sld [smem:[#allocation12_spill]]  ;;  %p36_p6 = scmp.ge.s32.totalorder %s34_s9, 2 }
  0x21   : > { %s41_s15 = sadd.s32 1, %s734_s20  ;;  %p48_p4 = scmp.ne.s32.totalorder %s734_s20, %s730_s19 }
  0x22   : > { %p49_p9 = scmp.eq.s32.totalorder %s746_s23, 0  ;;  %s999_s9 = smov (%p36_p6, %s34_s9), 0 }
  0x23   : > { %985 = sst [smem:[#allocation11_spill]] %s999_s9  ;;  %p872_p13 = por %p823_p2, %p48_p4 }
  0x24   : > { %p866_p12 = por %p49_p9, %p48_p4  ;;  %s38_s24 = ssub.s32 %s742_s22, %s999_s9 }
  0x25   : > { %p548_p0 = scmp.lt.s32.totalorder %s746_s23, 2  ;;  %s212_s25 = sand.u32 1, %s734_s20  }
  0x26   : > { %538 = dma.hbm_to_vmem [thread:$0]  (!%p848_p11), %s984_s3, 512, %s196_s7, [#allocation6], %s749_s11, %s749_s11, %s750_s12  }
  0x27   : > { %p39_p11 = scmp.eq.s32.totalorder %s38_s24, 0  ;;  %s497_s6 = sshll.u32 %s212_s25, 3 }
  0x28   : > { %s498_s8 = sshll.u32 %s742_s22, 7  ;;  %s216_s13 = scalar_lea.vmem [#allocation2], %s497_s6 }
  0x29   : > { %s881_s7 = scalar_select %p39_p11, %s734_s20, %s41_s15  }
  0x2a   : > { %s221_s12 = scalar_lea.hbm %s969_s0, %s498_s8  ;;  %s223_s14 = sshll.u32 %s216_s13, 4  ;;  %s224_s14 = int_to_ptr.vmem [resolvable:$true] %s223_s14 }
  0x2b   : > { %p889_p2 = pnand %p548_p0, %p866_p12  ;;  %s213_s3 = scalar_lea.sflag [#allocation3], %s212_s25 }
  0x2c   : > { %s647_s24 = scalar_lea.vmem %s224_s14, 128  ;;  %s751_s15 = smov [#allocation2]  }
  0x2d   : > { %p636_p3 = pneg %p889_p2  ;;  %p648_p5 = scmp.ne.s32.totalorder %s224_s14, %s647_s24 }
  0x2e   : > { %s652_s9 = sshll.u32 %s751_s15, 4  ;;  %s653_s9 = int_to_ptr.vmem [resolvable:$false] %s652_s9 }
  0x2f   : > { %p650_p7 = pnand %p648_p5, %p636_p3  ;;  %s654_s8 = scalar_lea.vmem %s653_s9, 256 }
  0x30   : > { %p655_p4 = scmp.lt.s32.totalorder %s224_s14, %s653_s9  ;;  %p656_p9 = scmp.lt.s32.totalorder %s654_s8, %s647_s24 }
  0x31   : > { %p651_p6 = pneg %p650_p7 }
  0x32   : > { %p657_p11 = por %p656_p9, %p655_p4 }
  0x34   : > { %p658_p10 = pnand %p657_p11, %p651_p6 }
  0x36   : > { %661 = shalt.err (!%p658_p10)
}
  0x37   : > { %542 = dma.hbm_to_vmem [thread:$0]  (!%p889_p2), %s221_s12, 128, %s224_s14, %s213_s3  }
  0x38   : > { %232 = sbr.rel (%p839_p8) target bundleno = 597 (0x255), region = 40  ;;  %s900_s16 = sand.u32 (!%p839_p8), 1, %s730_s19  }
  0x39   : > { %s500_s25 = sshll.u32 (!%p839_p8), %s900_s16, 3  ;;  %s235_s6 = scalar_lea.sflag (!%p839_p8), [#allocation3], %s900_s16 }
  0x3a   : > { %s238_s9 = scalar_lea.vmem (!%p839_p8), [#allocation2], %s500_s25  ;;  %p989_p12 = scmp.ne.s32.totalorder (!%p839_p8), %s980_s28, 0 }
  0x3d   : > { %713 = dma.done.wait (%p989_p12), %s235_s6, 128  }
  0x3e   : > { %715 = vsyncadd (%p989_p12), %s235_s6, 4294967168 }
  0x3f   : > { %717 = dma.done.wait (%p819_p1), [#allocation6], 512  }
  0x40   : > { %719 = vsyncadd (%p819_p1), [#allocation6], 4294966784  ;;  %vm270_vm0 = vcmask 261120   ;;  %v269_v0 = vld [vmem:[%s238_s9] sm:$0xff]  ;;  %v752_v8 = vmov 0.0   ;;  %vm753_vm1 = vmmov 0  }
  0x41   : > { %v271_v1 = vsel %vm270_vm0, %v269_v0, 0.0  ;;  %v304_v7 = vld [vmem:[#allocation5 + $0x18] sm:$0xff]  ;;  %516 = vmatprep.subr.mxu0 %v752_v8  ;;  %v303_v9 = vld [vmem:[#allocation5 + $0x10] sm:$0xff]  ;;  %524 = vmatprep.mubr.msk.f32.mxu0 %vm753_vm1, %v752_v8  ;;  %v302_v10 = vld [vmem:[#allocation5 + $0x8] sm:$0xff]  ;;  %s508_s12 = sshll.u32 %s738_s21, 7  ;;  %s268_s13 = scalar_lea.vmem [#allocation7], %s500_s25 }
  0x42   : > { %272 = vadd.xlane.f32.xlu0 %v271_v1  ;;  %517 = vmatpush3.msra.mxu0 %v304_v7  ;;  %v301_v11 = vld [vmem:[#allocation5] sm:$0xff]  ;;  %v503_v16 = vld [vmem:[%s970_s1] ss:$0 sm:$0xff]  ;;  %s403_s14 = sshll.u32 %s268_s13, 4  ;;  %s401_s15 = scalar_lea.hbm %s974_s5, %s508_s12  ;;  %s404_s14 = int_to_ptr.vmem [resolvable:$true] %s403_s14 }
  0x43   : > { %518 = vmatprep.subr.mxu0 %v752_v8  ;;  %v504_v18 = vld [vmem:[%s971_s2] ss:$0 sm:$0xff]  ;;  %s389_s8 = scalar_lea.sflag [#allocation4], %s900_s16  ;;  %s662_s6 = scalar_lea.vmem %s404_s14, 128 }
  0x44   : > { %519 = vmatpush3.msra.mxu0 %v303_v9  ;;  %v505_v21 = vld [vmem:[%s973_s4] ss:$0 sm:$0xff]  ;;  %p663_p1 = scmp.ne.s32.totalorder %s404_s14, %s662_s6  ;;  %s754_s9 = smov [#allocation7]  }
  0x45   : > { %520 = vmatprep.subr.mxu0 %v752_v8  ;;  %s666_s21 = sshll.u32 %s754_s9, 4  ;;  %s667_s21 = int_to_ptr.vmem [resolvable:$false] %s666_s21 }
  0x46   : > { %521 = vmatpush3.msra.mxu0 %v302_v10  ;;  %p664_p8 = pnand %p663_p1, %p872_p13  ;;  %s668_s25 = scalar_lea.vmem %s667_s21, 256 }
  0x47   : > { %522 = vmatprep.subr.mxu0 %v752_v8  ;;  %p669_p0 = scmp.lt.s32.totalorder %s404_s14, %s667_s21  ;;  %p670_p2 = scmp.lt.s32.totalorder %s668_s25, %s662_s6 }
  0x48   : > { %523 = vmatpush3.msra.mxu0 %v301_v11  ;;  %p665_p10 = pneg %p664_p8 }
  0x49   : > { %p671_p3 = por %p670_p2, %p669_p0 }
  0x4b   : > { %p672_p5 = pnand %p671_p3, %p665_p10 }
  0xcb   : > { %v273_v2 = vpop.xlane.xlu0 %272 }
  0xcc   : > { %v275_v3 = vmul.f32 0.03125, %v273_v2 }
  0xce   : > { %v276_v4 = vsub.f32 %v269_v0, %v275_v3 }
  0xd0   : > { %v277_v5 = vmul.f32 %v276_v4, %v276_v4 }
  0xd2   : > { %v278_v6 = vsel %vm270_vm0, %v277_v5, 0.0 }
  0xd3   : > { %279 = vadd.xlane.f32.xlu0 %v278_v6 }
 0x15c   : > { %v280_v12 = vpop.xlane.xlu0 %279 }
 0x15d   : > { %v281_v13 = vmul.f32 0.03125, %v280_v12 }
 0x15f   : > { %v282_v14 = vadd.f32 1e-05, %v281_v13 }
 0x161   : > { %604 = vrsqrt.f32 %v282_v14 }
 0x16e   : > { %v605_v15 = vpop.eup %604 }
 0x16f   : > { %v284_v17 = vmul.f32 %v605_v15, %v276_v4 }
 0x171   : > { %v292_v19 = vmul.f32 %v503_v16, %v284_v17 }
 0x173   : > { %v300_v20 = vadd.f32 %v504_v18, %v292_v19 }
 0x175   : > { %525 = vmatmul.mubr.msk.f32.vlgmr.msra.gmra.mxu0 %vm270_vm0, %v300_v20 }
 0x235   : > { %v381_v22 = vpop.f32.mrf.mxu0 }
 0x236   : > { %v382_v23 = vadd.f32 %v505_v21, %v381_v22 }
 0x237   : > { %v526_v24 = vpop.f32.mrf.mxu0 }
 0x238   : > { %606 = vtanh.f32 %v382_v23 }
 0x245   : > { %v607_v25 = vpop.eup %606 }
 0x246   : > { %v386_v26 = vadd.f32 %v607_v25, %v269_v0 }
 0x248   : > { %387 = vst.msk [vmem:[%s268_s13] sm:$0xff] %vm270_vm0, %v386_v26 }
 0x249   : > { %675 = shalt.err (!%p672_p5)
}
 0x24a   : > { %s676_s3 = scalar_lea.hbm %s401_s15, 128  ;;  %s680_s28 = scalar_lea.hbm %s974_s5, 256 }
 0x24b   : > { %p677_p7 = scmp.ne.s32.totalorder %s401_s15, %s676_s3  ;;  %p681_p9 = scmp.lt.s32.totalorder %s401_s15, %s974_s5 }
 0x24c   : > { %p682_p11 = scmp.lt.s32.totalorder %s680_s28, %s676_s3 }
 0x24d   : > { %p678_p6 = pnand %p677_p7, %p872_p13 }
 0x24e   : > { %p683_p12 = por %p682_p11, %p681_p9 }
 0x24f   : > { %p679_p4 = pneg %p678_p6 }
 0x251   : > { %p684_p1 = pnand %p683_p12, %p679_p4 }
 0x253   : > { %687 = shalt.err (!%p684_p1)
}
 0x254   : > { %533 = dma.vmem_to_hbm [thread:$0]  (%p872_p13), %s404_s14, 128, %s401_s15, %s389_s8  }
 0x255 PF: > { %s415_s11 = sand.u32 1, %s726_s18   ;;  %p990_p8 = scmp.ne.s32.totalorder %s981_s29, 0 }
 0x256   : > { %p991_p10 = scmp.ge.s32.totalorder %s746_s23, 2  ;;  %s416_s12 = scalar_lea.sflag [#allocation4], %s415_s11 }
 0x258   : > { %p544_p0 = pnand %p991_p10, %p990_p8 }
 0x25a   : > { %p545_p2 = pneg %p544_p0 }
 0x25c   : > { %721 = dma.done.wait (%p545_p2), %s416_s12, 128  }
 0x25d   : > { %723 = vsyncadd (%p545_p2), %s416_s12, 4294967168  ;;  %s22_s23 = sadd.s32 1, %s746_s23   ;;  %s992_s17 = sld [smem:[#allocation11_spill]] }
 0x25e   : > { %p19_p3 = scmp.ge.s32.totalorder %s22_s23, 4   ;;  %s993_s18 = smov %s730_s19 }
 0x25f   : > { %s994_s19 = smov %s734_s20  ;;  %s995_s20 = smov %s881_s7 }
 0x260   : > { %s996_s21 = smov %s742_s22  ;;  %21 = sbr.rel (!%p19_p3) target bundleno = 9 (0x9), region = 89 }
 0x263   : > { %s997_s22 = smov %s992_s17 }
 0x265   :  { %421 = vsyncpa [#allocation3], 1 }
 0x266   :  { %423 = vsyncpa [#allocation3 + $0x1], 1 }
 0x267   :  { %424 = vsyncpa [#allocation6], 1 }
 0x268   :  { %425 = vsyncpa [#allocation4], 1 }
 0x269   :  { %427 = vsyncpa [#allocation4 + $0x1], 1 }

</bundles_post_ra>
